<compile_context>
chip_gen: v6e
topology: v6e:2x2x1
jax: 0.10.0
libtpu: 0.0.40
codegen_flags: <defaults>
</compile_context>

<pallas_src>
import jax
import jax.numpy as jnp
from jax.experimental import pallas as pl
from jax.experimental.pallas import tpu as pltpu


def _segment_schedule(seq_length):
    """Statically reproduce the while-loop in adaptive_window_plr.

    Returns a list of (hi_idx, lo_idx, denom) so that each segment mean is
        (cumsum[:, hi_idx] - cumsum[:, lo_idx]) / denom
    with torch-style negative-index wrap for start == 0.
    """
    max_window = seq_length // 2
    segs = []
    window = 1
    start = 0
    while start < seq_length:
        end = min(start + window, seq_length)
        hi = end - 1
        lo = (start - 1) % seq_length  # start==0 -> cumsum[:, -1] (torch wrap)
        denom = float(end - start + 1)
        segs.append((hi, lo, denom))
        start += window
        window *= 2
        if window > max_window:
            window = max_window
    return segs


def _weight_matrix(L, n_seg_pad):
    """Build W (n_seg_pad, L) so that segment_mean[s] = sum_l W[s, l] * x[:, l, :].

    Row s is (indicator(j <= hi) - indicator(j <= lo)) / denom, which exactly
    reproduces (cumsum[:, hi] - cumsum[:, lo]) / denom, including the negative
    tail of the first segment (lo wraps to L-1).  Padding rows are all-zero so
    they contribute nothing to the sum of squares.
    """
    segs = _segment_schedule(L)
    idx = jnp.arange(L)
    rows = []
    for hi, lo, denom in segs:
        row = ((idx <= hi).astype(jnp.float32)
               - (idx <= lo).astype(jnp.float32)) / jnp.float32(denom)
        rows.append(row)
    for _ in range(n_seg_pad - len(segs)):
        rows.append(jnp.zeros((L,), jnp.float32))
    return jnp.stack(rows)  # (n_seg_pad, L) float32


def make_atplr_loss(B, L, F, block_b=None, block_f=None):
    segs = _segment_schedule(L)
    n_seg = len(segs)
    n_seg_pad = ((n_seg + 7) // 8) * 8          # sublane-align W (zero rows)
    W = _weight_matrix(L, n_seg_pad)

    # ---- lane (F) block: full F unless F is a large multiple of 128 --------
    if block_f is None:
        if F % 128 == 0 and F > 512:
            block_f = 512
            while F % block_f != 0:
                block_f -= 128
        else:
            block_f = F
    assert F % block_f == 0 and (block_f == F or block_f % 128 == 0)
    nf = F // block_f

    # ---- batch (B) block: largest divisor of B under a ~2 MiB block budget --
    # (2 inputs x 2 pipeline buffers x 2 MiB ~= 8-9 MiB of VMEM: safe on v5e's
    #  16 MiB default scoped limit and well inside v7x's 64 MiB physical VMEM.)
    itemsize = 4
    cap_bytes = 2 * 1024 * 1024
    if block_b is None:
        max_bb = max(1, min(8, cap_bytes // max(1, L * block_f * itemsize)))
        block_b = 1
        for d in range(1, B + 1):
            if B % d == 0 and d <= max_bb:
                block_b = d
    assert B % block_b == 0
    nb = B // block_b

    def kernel(w_ref, s1_ref, s2_ref, out_ref):
        # d computed once per tile; segment means are linear, W@(s1-s2).
        d = s1_ref[...].astype(jnp.float32) - s2_ref[...].astype(jnp.float32)
        w = w_ref[...]                                  # (n_seg_pad, L) f32
        acc = jnp.zeros((1, 1), jnp.float32)
        for b in range(block_b):                        # small static unroll
            # MXU: (n_seg_pad, L) @ (L, block_f) -> (n_seg_pad, block_f)
            seg = jnp.dot(w, d[b], preferred_element_type=jnp.float32)
            acc = acc + jnp.sum(seg * seg, keepdims=True)
        # Lane-dense per-tile partial (unmasked store); wrapper reads [0, 0].
        out_ref[...] = jnp.broadcast_to(acc, (8, 128))

    in_specs = [
        pl.BlockSpec((n_seg_pad, L), lambda i, j: (0, 0)),
        pl.BlockSpec((block_b, L, block_f), lambda i, j: (i, 0, j)),
        pl.BlockSpec((block_b, L, block_f), lambda i, j: (i, 0, j)),
    ]
    out_specs = pl.BlockSpec((8, 128), lambda i, j: (i, j))

    cost = pl.CostEstimate(
        flops=2 * B * n_seg_pad * L * F + 3 * B * L * F,
        transcendentals=0,
        bytes_accessed=2 * B * L * F * itemsize
        + n_seg_pad * L * itemsize
        + nb * nf * 8 * 128 * itemsize,
    )

    @jax.jit
    def atplr_loss(s1, s2):
        partials = pl.pallas_call(
            kernel,
            out_shape=jax.ShapeDtypeStruct((nb * 8, nf * 128), jnp.float32),
            grid=(nb, nf),
            in_specs=in_specs,
            out_specs=out_specs,
            compiler_params=pltpu.CompilerParams(
                dimension_semantics=("parallel", "parallel"),
                vmem_limit_bytes=32 * 1024 * 1024,
            ),
            cost_estimate=cost,
        )(W, s1, s2)
        # One scalar per (B-tile, F-tile): exact per-tile sum of squares.
        tile_sums = partials[0::8, 0::128]              # (nb, nf)
        # mean over segments, then mean over (B, F)
        return jnp.sum(tile_sums) / jnp.float32(n_seg * B * F)

    return atplr_loss


def _reference_loss(s1, s2):
    # Pure-JAX reference reproducing the PyTorch code verbatim.
    def adaptive_window_plr(s):
        B, L, F = s.shape
        cs = jnp.cumsum(s, axis=1)
        segs = []
        for hi, lo, denom in _segment_schedule(L):
            segs.append(((cs[:, hi] - cs[:, lo]) / denom).reshape(B, 1, F))
        return jnp.concatenate(segs, axis=1)

    a1 = adaptive_window_plr(s1)
    a2 = adaptive_window_plr(s2)
    diff = (a1 - a2) ** 2
    return jnp.mean(jnp.mean(diff, axis=1))


if __name__ == "__main__":
    B, L, F = 2, 8, 32
    key = jax.random.PRNGKey(0)
    k1, k2 = jax.random.split(key)
    s1 = jax.random.normal(k1, (B, L, F), dtype=jnp.float32)
    s2 = jax.random.normal(k2, (B, L, F), dtype=jnp.float32)

    ref = jax.block_until_ready(_reference_loss(s1, s2))

    # Default block choice (single tile at this toy size).
    loss_fn = make_atplr_loss(B, L, F)
    loss = jax.block_until_ready(loss_fn(s1, s2))
    assert jnp.allclose(loss, ref, rtol=1e-4, atol=1e-6), (loss, ref)

    # Force block_b=1 to exercise the multi-tile grid / per-tile-partials path.
    loss_fn_tiled = make_atplr_loss(B, L, F, block_b=1)
    loss_tiled = jax.block_until_ready(loss_fn_tiled(s1, s2))
    assert jnp.allclose(loss_tiled, ref, rtol=1e-4, atol=1e-6), (loss_tiled, ref)

    print("KERNEL_OK")
</pallas_src>

<mosaic_0001>
module attributes {stable_mosaic.version = 11 : i64} {
  func.func @kernel(%arg0: i32, %arg1: i32, %arg2: memref<8x8xf32, #tpu.memory_space<vmem>>, %arg3: memref<2x8x32xf32, #tpu.memory_space<vmem>>, %arg4: memref<2x8x32xf32, #tpu.memory_space<vmem>>, %arg5: memref<8x128xf32, #tpu.memory_space<vmem>>) attributes {dimension_semantics = [#tpu.dimension_semantics<parallel>, #tpu.dimension_semantics<parallel>], iteration_bounds = array<i64: 1, 1>, scalar_prefetch = 0 : i64, scratch_operands = 0 : i64, tpu.core_type = #tpu.core_type<tc>, window_params = [{pipeline_mode = #tpu.pipeline_mode<synchronous>, transform_indices = @transform_0, window_bounds = array<i64: 8, 8>}, {transform_indices = @transform_1, window_bounds = array<i64: 2, 8, 32>}, {transform_indices = @transform_2, window_bounds = array<i64: 2, 8, 32>}, {transform_indices = @transform_3, window_bounds = array<i64: 8, 128>}]} {
    %c0 = arith.constant 0 : index
    %c0_0 = arith.constant 0 : index
    %c0_1 = arith.constant 0 : index
    %0 = vector.load %arg3[%c0, %c0_0, %c0_1] : memref<2x8x32xf32, #tpu.memory_space<vmem>>, vector<2x8x32xf32>
    %c0_2 = arith.constant 0 : index
    %c0_3 = arith.constant 0 : index
    %c0_4 = arith.constant 0 : index
    %1 = vector.load %arg4[%c0_2, %c0_3, %c0_4] : memref<2x8x32xf32, #tpu.memory_space<vmem>>, vector<2x8x32xf32>
    %2 = arith.subf %0, %1 : vector<2x8x32xf32>
    %c0_5 = arith.constant 0 : index
    %c0_6 = arith.constant 0 : index
    %3 = vector.load %arg2[%c0_5, %c0_6] : memref<8x8xf32, #tpu.memory_space<vmem>>, vector<8x8xf32>
    %cst = arith.constant 0.000000e+00 : f32
    %4 = vector.broadcast %cst : f32 to vector<1x1xf32>
    %5 = vector.extract_strided_slice %2 {offsets = [0, 0, 0], sizes = [1, 8, 32], strides = [1, 1, 1]} : vector<2x8x32xf32> to vector<1x8x32xf32>
    %6 = vector.shape_cast %5 : vector<1x8x32xf32> to vector<8x32xf32>
    %cst_7 = arith.constant dense<0.000000e+00> : vector<8x32xf32>
    %7 = tpu.matmul %3, %6, %cst_7 {dimension_numbers = #tpu.dot_dimension_numbers<[1], [0], [0], [1], [0, 0, 1, 1], [], []>} : vector<8x8xf32>, vector<8x32xf32>, vector<8x32xf32> -> vector<8x32xf32>
    %8 = arith.mulf %7, %7 : vector<8x32xf32>
    %9 = vector.shape_cast %8 : vector<8x32xf32> to vector<1x8x32xf32>
    %cst_8 = arith.constant dense<0.000000e+00> : vector<1xf32>
    %10 = vector.multi_reduction <add>, %9, %cst_8 [1, 2] : vector<1x8x32xf32> to vector<1xf32>
    %11 = vector.shape_cast %10 : vector<1xf32> to vector<1x1x1xf32>
    %12 = vector.extract %11[0, 0, 0] : f32 from vector<1x1x1xf32>
    %13 = vector.broadcast %12 : f32 to vector<1x1xf32>
    %14 = arith.addf %4, %13 : vector<1x1xf32>
    %15 = vector.extract_strided_slice %2 {offsets = [1, 0, 0], sizes = [1, 8, 32], strides = [1, 1, 1]} : vector<2x8x32xf32> to vector<1x8x32xf32>
    %16 = vector.shape_cast %15 : vector<1x8x32xf32> to vector<8x32xf32>
    %cst_9 = arith.constant dense<0.000000e+00> : vector<8x32xf32>
    %17 = tpu.matmul %3, %16, %cst_9 {dimension_numbers = #tpu.dot_dimension_numbers<[1], [0], [0], [1], [0, 0, 1, 1], [], []>} : vector<8x8xf32>, vector<8x32xf32>, vector<8x32xf32> -> vector<8x32xf32>
    %18 = arith.mulf %17, %17 : vector<8x32xf32>
    %19 = vector.shape_cast %18 : vector<8x32xf32> to vector<1x8x32xf32>
    %cst_10 = arith.constant dense<0.000000e+00> : vector<1xf32>
    %20 = vector.multi_reduction <add>, %19, %cst_10 [1, 2] : vector<1x8x32xf32> to vector<1xf32>
    %21 = vector.shape_cast %20 : vector<1xf32> to vector<1x1x1xf32>
    %22 = vector.extract %21[0, 0, 0] : f32 from vector<1x1x1xf32>
    %23 = vector.broadcast %22 : f32 to vector<1x1xf32>
    %24 = arith.addf %14, %23 : vector<1x1xf32>
    %25 = vector.shape_cast %24 : vector<1x1xf32> to vector<1x1xf32>
    %26 = vector.broadcast %25 : vector<1x1xf32> to vector<8x128xf32>
    %c0_11 = arith.constant 0 : index
    %c0_12 = arith.constant 0 : index
    %27 = vector.load %arg5[%c0_11, %c0_12] : memref<8x128xf32, #tpu.memory_space<vmem>>, vector<8x128xf32>
    tpu.vector_store %arg5[%c0_11, %c0_12], %26 {strides = array<i32>} : memref<8x128xf32, #tpu.memory_space<vmem>>, vector<8x128xf32>,
    return
  }
  func.func @transform_0(%arg0: i32, %arg1: i32) -> (i32, i32) {
    %c0_i32 = arith.constant 0 : i32
    %c0_i32_0 = arith.constant 0 : i32
    %c0_i32_1 = arith.constant 0 : i32
    return %c0_i32, %c0_i32_0 : i32, i32
  }
  func.func @transform_1(%arg0: i32, %arg1: i32) -> (i32, i32, i32) {
    %c0_i32 = arith.constant 0 : i32
    %c0_i32_0 = arith.constant 0 : i32
    return %arg0, %c0_i32, %arg1 : i32, i32, i32
  }
  func.func @transform_2(%arg0: i32, %arg1: i32) -> (i32, i32, i32) {
    %c0_i32 = arith.constant 0 : i32
    %c0_i32_0 = arith.constant 0 : i32
    return %arg0, %c0_i32, %arg1 : i32, i32, i32
  }
  func.func @transform_3(%arg0: i32, %arg1: i32) -> (i32, i32) {
    %c0_i32 = arith.constant 0 : i32
    return %arg0, %arg1 : i32, i32
  }
}

</mosaic_0001>

<bundles_post_ra>
// kernel: atplr_loss.1
= control target key start
LH: loop header
LB: loop body
LE: loop exit
PB: predicated region body
PF: predicated region fallthrough
CT: control target
= control target key end

     0   :  { %8 = vsyncpa [#allocation3], 0  ;;  %s368_s0 = inlined_call_operand.hbm [shape: f32[8,8], index: 0, kind: input, shape index: {}]   ;;  %s369_s1 = inlined_call_operand.hbm [shape: f32[2,8,32], index: 1, kind: input, shape index: {}]   ;;  %s370_s2 = inlined_call_operand.hbm [shape: f32[2,8,32], index: 2, kind: input, shape index: {}]   ;;  %s371_s3 = inlined_call_operand.vmem [shape: f32[8,128], index: 3, kind: output, shape index: {}]  }
   0x1   :  { %9 = vsyncpa [#allocation5], 0  ;;  %s329_s12 = smov [#allocation4]  }
   0x2   :  { %s25_s13 = sshll.u32 %s329_s12, 4  ;;  %s26_s13 = int_to_ptr.vmem [resolvable:$true] %s25_s13 }
   0x3   :  { %s273_s14 = scalar_lea.vmem %s26_s13, 256  ;;  %p278_p1 = scmp.lt.s32.totalorder %s26_s13, %s26_s13 }
   0x4   :  { %p274_p0 = scmp.ne.s32.totalorder %s26_s13, %s273_s14  ;;  %p279_p2 = scmp.lt.s32.totalorder %s273_s14, %s273_s14 }
   0x6   :  { %p280_p3 = por %p279_p2, %p278_p1 }
   0x8   :  { %p281_p4 = pnand %p280_p3, %p274_p0 }
   0xa   :  { %284 = shalt.err (!%p281_p4)
}
   0xb   :  { %s330_s15 = smov 128   ;;  %s331_s16 = smov 8  }
   0xc   :  { %31 = dma.hbm_to_vmem [thread:$0]  %s369_s1, 256, %s26_s13, [#allocation5], %s330_s15, %s330_s15, %s331_s16  }
   0xd   :  { %s332_s19 = smov [#allocation2]   ;;  %s333_s21 = smov [#allocation6]  }
   0xe   :  { %s16_s20 = sshll.u32 %s332_s19, 4  ;;  %s37_s22 = sshll.u32 %s333_s21, 4  ;;  %s17_s20 = int_to_ptr.vmem [resolvable:$true] %s16_s20  ;;  %s38_s22 = int_to_ptr.vmem [resolvable:$true] %s37_s22 }
   0xf   :  { %s293_s23 = scalar_lea.vmem %s17_s20, 128  ;;  %p298_p6 = scmp.lt.s32.totalorder %s17_s20, %s17_s20 }
  0x10   :  { %p294_p5 = scmp.ne.s32.totalorder %s17_s20, %s293_s23  ;;  %p299_p7 = scmp.lt.s32.totalorder %s293_s23, %s293_s23 }
  0x12   :  { %p300_p8 = por %p299_p7, %p298_p6 }
  0x14   :  { %p301_p9 = pnand %p300_p8, %p294_p5 }
  0x16   :  { %304 = shalt.err (!%p301_p9)
}
  0x17   :  { %19 = dma.hbm_to_vmem [thread:$0]  %s368_s0, 128, %s17_s20, [#allocation3]  }
  0x18   :  { %s313_s26 = scalar_lea.vmem %s38_s22, 256  ;;  %p318_p11 = scmp.lt.s32.totalorder %s38_s22, %s38_s22 }
  0x19   :  { %p314_p10 = scmp.ne.s32.totalorder %s38_s22, %s313_s26  ;;  %p319_p12 = scmp.lt.s32.totalorder %s313_s26, %s313_s26 }
  0x1b   :  { %p320_p13 = por %p319_p12, %p318_p11 }
  0x1d   :  { %p321_p0 = pnand %p320_p13, %p314_p10 }
  0x1f   :  { %324 = shalt.err (!%p321_p0)
}
  0x20   :  { %43 = dma.hbm_to_vmem [thread:$0]  %s370_s2, 256, %s38_s22, [#allocation5], %s330_s15, %s330_s15, %s331_s16  }
  0x21   :  { %325 = dma.done.wait [#allocation3], 128  }
  0x22   :  { %326 = vsyncadd [#allocation3], 4294967168 }
  0x23   :  { %327 = dma.done.wait [#allocation5], 512  }
  0x24   :  { %328 = vsyncadd [#allocation5], 4294966784  ;;  %v334_v0 = vmov 0.0   ;;  %vm335_vm0 = vmmov 0   ;;  %v53_v1 = vld [vmem:[#allocation4] sm:$0xff]  ;;  %v55_v2 = vld [vmem:[#allocation6] sm:$0xff] }
  0x25   :  { %244 = vmatprep.subr.mxu0 %v334_v0  ;;  %246 = vmatprep.mubr.msk.f32.mxu0 %vm335_vm0, %v334_v0  ;;  %v57_v3 = vsub.f32 %v53_v1, %v55_v2  ;;  %v59_v4 = vld [vmem:[#allocation2] sm:$0xff]  ;;  %vm60_vm1 = vcmask 64512   ;;  %v54_v5 = vld [vmem:[#allocation4 + $0x8] sm:$0xff]  ;;  %vm135_vm2 = vcmask 261120  }
  0x26   :  { %249 = vmatprep.subr.mxu1 %v334_v0  ;;  %251 = vmatprep.mubr.msk.f32.mxu1 %vm335_vm0, %v334_v0  ;;  %v56_v6 = vld [vmem:[#allocation6 + $0x8] sm:$0xff] }
  0x27   :  { %v58_v7 = vsub.f32 %v54_v5, %v56_v6  ;;  %245 = vmatpush3.msra.mxu0 %v57_v3 }
  0x28   :  { %247 = vmatmul.mubr.msk.f32.vlgmr.msra.gmra.mxu0 %vm60_vm1, %v59_v4 }
  0x29   :  { %250 = vmatpush3.msra.mxu1 %v58_v7 }
  0x2a   :  { %252 = vmatmul.mubr.msk.f32.vlgmr.msra.gmra.mxu1 %vm60_vm1, %v59_v4 }
  0xe8   :  { %v130_v8 = vpop.f32.mrf.mxu0 }
  0xe9   :  { %v134_v9 = vmul.f32 %v130_v8, %v130_v8 }
  0xea   :  { %v214_v10 = vpop.f32.mrf.mxu1  ;;  %v248_v11 = vpop.f32.mrf.mxu0 }
  0xeb   :  { %v218_v12 = vmul.f32 %v214_v10, %v214_v10  ;;  %v136_v14 = vsel %vm135_vm2, %v134_v9, 0.0 }
  0xec   :  { %v253_v13 = vpop.f32.mrf.mxu1  ;;  %137 = vadd.xlane.f32.xlu0 %v136_v14 }
  0xed   :  { %v219_v15 = vsel %vm135_vm2, %v218_v12, 0.0 }
  0xf0   :  { %220 = vadd.xlane.f32.xlu0 %v219_v15 }
 0x175   :  { %v138_v16 = vpop.xlane.xlu0 %137 }
 0x176   :  { %v139_v17 = vrot.slane %v138_v16, 4 }
 0x178   :  { %v140_v18 = vadd.f32 %v139_v17, %v138_v16 }
 0x179   :  { %v221_v19 = vpop.xlane.xlu0 %220 }
 0x17a   :  { %v141_v20 = vrot.slane %v140_v18, 2  ;;  %v222_v21 = vrot.slane %v221_v19, 4 }
 0x17c   :  { %v223_v22 = vadd.f32 %v222_v21, %v221_v19  ;;  %v142_v23 = vadd.f32 %v141_v20, %v140_v18 }
 0x17e   :  { %v224_v24 = vrot.slane %v223_v22, 2  ;;  %v143_v25 = vrot.slane %v142_v23, 1 }
 0x180   :  { %v225_v26 = vadd.f32 %v224_v24, %v223_v22  ;;  %v144_v27 = vadd.f32 %v143_v25, %v142_v23 }
 0x182   :  { %254 = vpush %v144_v27  ;;  %v226_v28 = vrot.slane %v225_v26, 1 }
 0x184   :  { %v227_v29 = vadd.f32 %v226_v28, %v225_v26 }
 0x186   :  { %256 = vpush %v227_v29 }
 0x1b3   :  { %s255_s0 = spop %254 }
 0x1b4   :  { %v146_v30 = vstv %s255_s0 }
 0x1b7   :  { %s257_s2 = spop %256 }
 0x1b8   :  { %v229_v31 = vstv %s257_s2 }
 0x1b9   :  { %v230_v32 = vadd.f32 %v229_v31, %v146_v30 }
 0x1bb   :  { %231 = vst [vmem:[%s371_s3] sm:$0xff] %v230_v32 }
 0x1bc   :  { %236 = vsyncpa [#allocation3], 1 }
 0x1bd   :  { %237 = vsyncpa [#allocation5], 1 }

</bundles_post_ra>
